<compile_context>
chip_gen: v7x
topology: tpu7x:2x2x1
jax: 0.10.0
libtpu: 0.0.40
codegen_flags: <defaults>
</compile_context>

<pallas_src>
import math

import jax
import jax.numpy as jnp
from jax.experimental import pallas as pl
from jax.experimental.pallas import tpu as pltpu


LN_EPS = 1e-5
MASK_FILL = -10000.0


def _round_up(x, m):
    return ((x + m - 1) // m) * m


def entity_linker_kernel(cand_ref, mention_ref, prior_ref, mask_ref,
                         ln_ref, w1bd_ref, w2bd_ref, b2_ref, out_ref):
    # Per grid step:
    #   cand_ref    [TN, C, D]   native dtype (dominant HBM traffic)
    #   mention_ref [TN, D]      native dtype
    #   prior_ref   [TN, C]      f32
    #   mask_ref    [TN, C]      int32 (0 / 1)
    #   ln_ref      [2, D]       f32: row 0 = gamma, row 1 = beta
    #   w1bd_ref    [3C, C*Hp]   f32 block-diag: [scores | priors | bias] blocks
    #   w2bd_ref    [C*Hp, C]    f32 block-diag second layer
    #   b2_ref      [1, 1]       f32
    #   out_ref     [TN, C]      f32
    x = cand_ref[...].astype(jnp.float32)            # [TN, C, D]
    m = mention_ref[...].astype(jnp.float32)         # [TN, D]
    d = x.shape[-1]
    inv_d = jnp.float32(1.0 / d)
    inv_sqrt_d = jnp.float32(1.0 / math.sqrt(d))

    ln = ln_ref[...]                                 # [2, D]
    gamma = ln[0:1, :]                               # [1, D]
    beta = ln[1:2, :]                                # [1, D]

    # Fold LayerNorm affine + mention dot:
    #   sum_D(LN(x)*gamma*m + beta*m)
    #     = rstd * (x.(gamma*m) - mean * sum(gamma*m)) + sum(beta*m)
    gm = gamma * m                                   # [TN, D]
    s_gm = jnp.sum(gm, axis=-1, keepdims=True)       # [TN, 1]
    bm = jnp.sum(beta * m, axis=-1, keepdims=True)   # [TN, 1]

    # D-axis reductions over the streamed tile (the dominant VPU/XLU work).
    # gm[:, None, :] is a per-slab sublane broadcast; it should not materialize
    # a [TN, C, D] temporary (check the Mosaic dump if this becomes binding).
    sum_x = jnp.sum(x, axis=-1)                      # [TN, C]
    sum_x2 = jnp.sum(x * x, axis=-1)                 # [TN, C]
    xdot = jnp.sum(x * gm[:, None, :], axis=-1)      # [TN, C]
    # NOTE: a further rebalance (sum_x via x @ ones on the MXU) is possible if
    # the XLU ever becomes the binding slot on v7x.

    mean = sum_x * inv_d
    var = sum_x2 * inv_d - mean * mean               # biased variance (nn.LayerNorm)
    rstd = jax.lax.rsqrt(var + jnp.float32(LN_EPS))
    scores = ((xdot - mean * s_gm) * rstd + bm) * inv_sqrt_d   # [TN, C]

    priors = prior_ref[...]                          # [TN, C]

    # score MLP Linear(2,H)->ReLU->Linear(H,1) on the MXU, directly in the
    # [TN, C] layout, via block-diagonal weights:
    #   h[n, c*Hp+j] = relu(scores[n,c]*w1[0,j] + priors[n,c]*w1[1,j] + b1[j])
    #   link[n, c]   = sum_j h[n, c*Hp+j] * w2[j] + b2
    feat = jnp.concatenate(
        [scores, priors, jnp.ones_like(scores)], axis=-1)       # [TN, 3C]
    h = jnp.dot(feat, w1bd_ref[...],
                preferred_element_type=jnp.float32)             # [TN, C*Hp]
    h = jnp.maximum(h, 0.0)
    link = jnp.dot(h, w2bd_ref[...],
                   preferred_element_type=jnp.float32)          # [TN, C]
    link = link + b2_ref[...]

    # masked_fill(~candidate_mask, -10000.0)
    mask = mask_ref[...]                             # [TN, C]
    out_ref[...] = jnp.where(mask > 0, link, jnp.float32(MASK_FILL))


def _pack_mlp_params(w1, b1, w2, C):
    """Build block-diagonal MXU weights for the score MLP.

    w1: [2, H], b1: [H], w2: [H].  Hidden dim is zero-padded to a lane-dense
    multiple of 128 (padded units contribute exactly 0: relu(0)=0, w2_pad=0).
    Returns W1_bd [3C, C*Hp] (scores / priors / bias blocks) and W2_bd [C*Hp, C].
    """
    H = w1.shape[1]
    Hp = _round_up(H, 128)
    w1p = jnp.pad(w1.astype(jnp.float32), ((0, 0), (0, Hp - H)))    # [2, Hp]
    b1p = jnp.pad(b1.astype(jnp.float32), (0, Hp - H))              # [Hp]
    w2p = jnp.pad(w2.astype(jnp.float32), (0, Hp - H))              # [Hp]
    eye = jnp.eye(C, dtype=jnp.float32)
    blk_s = jnp.kron(eye, w1p[0].reshape(1, Hp))                    # [C, C*Hp]
    blk_p = jnp.kron(eye, w1p[1].reshape(1, Hp))                    # [C, C*Hp]
    blk_b = jnp.kron(eye, b1p.reshape(1, Hp))                       # [C, C*Hp]
    w1_bd = jnp.concatenate([blk_s, blk_p, blk_b], axis=0)          # [3C, C*Hp]
    w2_bd = jnp.kron(eye, w2p.reshape(Hp, 1))                       # [C*Hp, C]
    return w1_bd, w2_bd, Hp


def entity_linker_forward(candidate_embeddings, candidate_mask, candidate_priors,
                          mention_span_representations, params, tile_n=512):
    """Pallas forward.

    Candidates / mention reprs stream in their native dtype (pass bf16 from the
    caller on v5e/v6e to halve HBM traffic; the kernel upcasts to f32 for the
    LayerNorm math).  tile_n is additionally capped so the streamed candidate
    tile stays ~2 MiB f32: big enough to amortize the ~0.35 us per-grid-step
    overhead, small enough for v7x's 64 MiB VMEM with double buffering plus the
    [tn, C*Hp] MLP intermediate.  The grid is forced to >=2 steps whenever
    there is enough work so both v7x TensorCores get a share.
    """
    B, M, C, D = candidate_embeddings.shape
    N = B * M

    cand = candidate_embeddings.reshape(N, C, D)
    mention = mention_span_representations.reshape(N, D)
    priors = candidate_priors.reshape(N, C).astype(jnp.float32)
    mask = candidate_mask.reshape(N, C).astype(jnp.int32)

    # --- parameter packing (tiny, constant-index operands) ---
    gamma = params["gamma"].reshape(1, D).astype(jnp.float32)
    beta = params["beta"].reshape(1, D).astype(jnp.float32)
    ln = jnp.concatenate([gamma, beta], axis=0)                     # [2, D]
    w1_bd, w2_bd, Hp = _pack_mlp_params(params["w1"], params["b1"],
                                        params["w2"], C)
    b2 = params["b2"].reshape(1, 1).astype(jnp.float32)

    # --- tile selection ---
    row_bytes = C * D * 4                                   # f32 worst case
    cap_rows = max(8, (2 * 1024 * 1024) // row_bytes)       # ~2 MiB candidate tile
    tn = min(tile_n, cap_rows, _round_up(N, 8))
    if N >= 16:
        # prefer >=2 grid steps (v7x has 2 TensorCores; "parallel" only helps
        # if there is more than one step to shard).
        tn = min(tn, _round_up((N + 1) // 2, 8))
    tn = max(8, (tn // 8) * 8)                               # sublane multiple

    n_pad = _round_up(N, tn)
    if n_pad != N:
        pad = n_pad - N
        cand = jnp.pad(cand, ((0, pad), (0, 0), (0, 0)))
        mention = jnp.pad(mention, ((0, pad), (0, 0)))
        priors = jnp.pad(priors, ((0, pad), (0, 0)))
        mask = jnp.pad(mask, ((0, pad), (0, 0)))             # pad rows masked out

    grid = (n_pad // tn,)

    out = pl.pallas_call(
        entity_linker_kernel,
        out_shape=jax.ShapeDtypeStruct((n_pad, C), jnp.float32),
        grid_spec=pltpu.PrefetchScalarGridSpec(
            num_scalar_prefetch=0,
            grid=grid,
            in_specs=[
                pl.BlockSpec((tn, C, D), lambda n: (n, 0, 0)),    # candidates (streamed)
                pl.BlockSpec((tn, D), lambda n: (n, 0)),          # mention reprs
                pl.BlockSpec((tn, C), lambda n: (n, 0)),          # priors
                pl.BlockSpec((tn, C), lambda n: (n, 0)),          # mask
                pl.BlockSpec((2, D), lambda n: (0, 0)),           # LN gamma/beta (once)
                pl.BlockSpec((3 * C, C * Hp), lambda n: (0, 0)),  # MLP layer 1 (block-diag)
                pl.BlockSpec((C * Hp, C), lambda n: (0, 0)),      # MLP layer 2 (block-diag)
                pl.BlockSpec((1, 1), lambda n: (0, 0)),           # MLP bias 2
            ],
            out_specs=pl.BlockSpec((tn, C), lambda n: (n, 0)),
        ),
        compiler_params=pltpu.CompilerParams(
            dimension_semantics=("parallel",),
            vmem_limit_bytes=48 * 1024 * 1024),
    )(cand, mention, priors, mask, ln, w1_bd, w2_bd, b2)

    return out[:N].reshape(B, M, C)


def reference_forward(cand, mask, priors, mention, params):
    """Pure-JAX reference of the same math (standard two-pass LayerNorm)."""
    D = cand.shape[-1]
    mean = jnp.mean(cand, axis=-1, keepdims=True)
    var = jnp.mean((cand - mean) ** 2, axis=-1, keepdims=True)
    x_ln = (cand - mean) / jnp.sqrt(var + LN_EPS)
    x_ln = x_ln * params["gamma"] + params["beta"]
    scores = jnp.sum(x_ln * mention[..., None, :], axis=-1) / math.sqrt(D)
    feat = jnp.stack([scores, priors], axis=-1)                     # [B,M,C,2]
    h = jnp.maximum(feat @ params["w1"] + params["b1"], 0.0)        # [B,M,C,H]
    link = h @ params["w2"] + params["b2"]
    return jnp.where(mask > 0, link, MASK_FILL)


def init_params(key, D, H):
    """score_mlp Linear(2,H)->ReLU->Linear(H,1) with normal(std=0.02) weights,
    zero biases; LayerNorm affine given non-trivial values so the LN fold is
    exercised."""
    k1, k2, k3, k4 = jax.random.split(key, 4)
    return {
        "gamma": 1.0 + 0.02 * jax.random.normal(k3, (D,), jnp.float32),
        "beta": 0.02 * jax.random.normal(k4, (D,), jnp.float32),
        "w1": 0.02 * jax.random.normal(k1, (2, H), jnp.float32),
        "b1": jnp.zeros((H,), jnp.float32),
        "w2": 0.02 * jax.random.normal(k2, (H,), jnp.float32),
        "b2": jnp.zeros((), jnp.float32),
    }


if __name__ == "__main__":
    B, M, C, D, H = 2, 4, 8, 128, 100

    key = jax.random.PRNGKey(0)
    k_cand, k_mention, k_prior, k_mask, k_params = jax.random.split(key, 5)

    candidate_embeddings = jax.random.normal(k_cand, (B, M, C, D), jnp.float32)
    mention_span_representations = jax.random.normal(k_mention, (B, M, D), jnp.float32)
    candidate_priors = jax.random.uniform(k_prior, (B, M, C), jnp.float32)
    candidate_mask = (jax.random.uniform(k_mask, (B, M, C)) > 0.3).astype(jnp.int32)

    params = init_params(k_params, D, H)

    out = entity_linker_forward(candidate_embeddings, candidate_mask,
                                candidate_priors, mention_span_representations,
                                params)
    out = jax.block_until_ready(out)

    ref = reference_forward(candidate_embeddings, candidate_mask,
                            candidate_priors, mention_span_representations,
                            params)
    assert out.shape == (B, M, C)
    assert jnp.allclose(out, ref, atol=2e-3, rtol=2e-3), "mismatch vs reference"

    print("KERNEL_OK")
</pallas_src>

<mosaic_0001>
module attributes {stable_mosaic.version = 11 : i64} {
  func.func @entity_linker_kernel(%arg0: i32, %arg1: memref<8x8x128xf32, #tpu.memory_space<vmem>>, %arg2: memref<8x128xf32, #tpu.memory_space<vmem>>, %arg3: memref<8x8xf32, #tpu.memory_space<vmem>>, %arg4: memref<8x8xi32, #tpu.memory_space<vmem>>, %arg5: memref<2x128xf32, #tpu.memory_space<vmem>>, %arg6: memref<24x1024xf32, #tpu.memory_space<vmem>>, %arg7: memref<1024x8xf32, #tpu.memory_space<vmem>>, %arg8: memref<1x1xf32, #tpu.memory_space<vmem>>, %arg9: memref<8x8xf32, #tpu.memory_space<vmem>>) attributes {dimension_semantics = [#tpu.dimension_semantics<parallel>], iteration_bounds = array<i64: 1>, scalar_prefetch = 0 : i64, scratch_operands = 0 : i64, tpu.core_type = #tpu.core_type<tc>, window_params = [{transform_indices = @transform_0, window_bounds = array<i64: 8, 8, 128>}, {transform_indices = @transform_1, window_bounds = array<i64: 8, 128>}, {transform_indices = @transform_2, window_bounds = array<i64: 8, 8>}, {transform_indices = @transform_3, window_bounds = array<i64: 8, 8>}, {pipeline_mode = #tpu.pipeline_mode<synchronous>, transform_indices = @transform_4, window_bounds = array<i64: 2, 128>}, {pipeline_mode = #tpu.pipeline_mode<synchronous>, transform_indices = @transform_5, window_bounds = array<i64: 24, 1024>}, {pipeline_mode = #tpu.pipeline_mode<synchronous>, transform_indices = @transform_6, window_bounds = array<i64: 1024, 8>}, {pipeline_mode = #tpu.pipeline_mode<synchronous>, transform_indices = @transform_7, window_bounds = array<i64: 1, 1>}, {transform_indices = @transform_8, window_bounds = array<i64: 8, 8>}]} {
    %c0 = arith.constant 0 : index
    %c0_0 = arith.constant 0 : index
    %c0_1 = arith.constant 0 : index
    %0 = vector.load %arg1[%c0, %c0_0, %c0_1] : memref<8x8x128xf32, #tpu.memory_space<vmem>>, vector<8x8x128xf32>
    %c0_2 = arith.constant 0 : index
    %c0_3 = arith.constant 0 : index
    %1 = vector.load %arg2[%c0_2, %c0_3] : memref<8x128xf32, #tpu.memory_space<vmem>>, vector<8x128xf32>
    %c0_4 = arith.constant 0 : index
    %c0_5 = arith.constant 0 : index
    %2 = vector.load %arg5[%c0_4, %c0_5] : memref<2x128xf32, #tpu.memory_space<vmem>>, vector<2x128xf32>
    %3 = vector.extract_strided_slice %2 {offsets = [0, 0], sizes = [1, 128], strides = [1, 1]} : vector<2x128xf32> to vector<1x128xf32>
    %4 = vector.extract_strided_slice %2 {offsets = [1, 0], sizes = [1, 128], strides = [1, 1]} : vector<2x128xf32> to vector<1x128xf32>
    %5 = vector.broadcast %3 : vector<1x128xf32> to vector<8x128xf32>
    %6 = arith.mulf %5, %1 : vector<8x128xf32>
    %cst = arith.constant dense<0.000000e+00> : vector<8xf32>
    %7 = vector.multi_reduction <add>, %6, %cst [1] : vector<8x128xf32> to vector<8xf32>
    %8 = vector.shape_cast %7 : vector<8xf32> to vector<8x1xf32>
    %9 = vector.broadcast %4 : vector<1x128xf32> to vector<8x128xf32>
    %10 = arith.mulf %9, %1 : vector<8x128xf32>
    %cst_6 = arith.constant dense<0.000000e+00> : vector<8xf32>
    %11 = vector.multi_reduction <add>, %10, %cst_6 [1] : vector<8x128xf32> to vector<8xf32>
    %12 = vector.shape_cast %11 : vector<8xf32> to vector<8x1xf32>
    %cst_7 = arith.constant dense<0.000000e+00> : vector<8x8xf32>
    %13 = vector.multi_reduction <add>, %0, %cst_7 [2] : vector<8x8x128xf32> to vector<8x8xf32>
    %14 = arith.mulf %0, %0 : vector<8x8x128xf32>
    %cst_8 = arith.constant dense<0.000000e+00> : vector<8x8xf32>
    %15 = vector.multi_reduction <add>, %14, %cst_8 [2] : vector<8x8x128xf32> to vector<8x8xf32>
    %16 = vector.shape_cast %6 : vector<8x128xf32> to vector<8x1x128xf32>
    %17 = vector.broadcast %16 : vector<8x1x128xf32> to vector<8x8x128xf32>
    %18 = arith.mulf %0, %17 : vector<8x8x128xf32>
    %cst_9 = arith.constant dense<0.000000e+00> : vector<8x8xf32>
    %19 = vector.multi_reduction <add>, %18, %cst_9 [2] : vector<8x8x128xf32> to vector<8x8xf32>
    %cst_10 = arith.constant 7.812500e-03 : f32
    %20 = vector.broadcast %cst_10 : f32 to vector<8x8xf32>
    %21 = arith.mulf %13, %20 : vector<8x8xf32>
    %cst_11 = arith.constant 7.812500e-03 : f32
    %22 = vector.broadcast %cst_11 : f32 to vector<8x8xf32>
    %23 = arith.mulf %15, %22 : vector<8x8xf32>
    %24 = arith.mulf %21, %21 : vector<8x8xf32>
    %25 = arith.subf %23, %24 : vector<8x8xf32>
    %cst_12 = arith.constant 9.99999974E-6 : f32
    %26 = vector.broadcast %cst_12 : f32 to vector<8x8xf32>
    %27 = arith.addf %25, %26 : vector<8x8xf32>
    %28 = math.rsqrt %27 : vector<8x8xf32>
    %29 = vector.broadcast %8 : vector<8x1xf32> to vector<8x8xf32>
    %30 = arith.mulf %21, %29 : vector<8x8xf32>
    %31 = arith.subf %19, %30 : vector<8x8xf32>
    %32 = arith.mulf %31, %28 : vector<8x8xf32>
    %33 = vector.broadcast %12 : vector<8x1xf32> to vector<8x8xf32>
    %34 = arith.addf %32, %33 : vector<8x8xf32>
    %cst_13 = arith.constant 0.0883883461 : f32
    %35 = vector.broadcast %cst_13 : f32 to vector<8x8xf32>
    %36 = arith.mulf %34, %35 : vector<8x8xf32>
    %c0_14 = arith.constant 0 : index
    %c0_15 = arith.constant 0 : index
    %37 = vector.load %arg3[%c0_14, %c0_15] : memref<8x8xf32, #tpu.memory_space<vmem>>, vector<8x8xf32>
    %cst_16 = arith.constant 1.000000e+00 : f32
    %38 = vector.broadcast %cst_16 : f32 to vector<8x8xf32>
    %39 = tpu.concatenate %36, %37, %38 in 1 : vector<8x8xf32>, vector<8x8xf32>, vector<8x8xf32> -> vector<8x24xf32>
    %c0_17 = arith.constant 0 : index
    %c0_18 = arith.constant 0 : index
    %40 = vector.load %arg6[%c0_17, %c0_18] : memref<24x1024xf32, #tpu.memory_space<vmem>>, vector<24x1024xf32>
    %cst_19 = arith.constant dense<0.000000e+00> : vector<8x1024xf32>
    %41 = tpu.matmul %39, %40, %cst_19 {dimension_numbers = #tpu.dot_dimension_numbers<[1], [0], [0], [1], [0, 0, 1, 1], [], []>} : vector<8x24xf32>, vector<24x1024xf32>, vector<8x1024xf32> -> vector<8x1024xf32>
    %cst_20 = arith.constant 0.000000e+00 : f32
    %42 = vector.broadcast %cst_20 : f32 to vector<8x1024xf32>
    %43 = arith.maximumf %41, %42 : vector<8x1024xf32>
    %c0_21 = arith.constant 0 : index
    %c0_22 = arith.constant 0 : index
    %44 = vector.load %arg7[%c0_21, %c0_22] : memref<1024x8xf32, #tpu.memory_space<vmem>>, vector<1024x8xf32>
    %cst_23 = arith.constant dense<0.000000e+00> : vector<8x8xf32>
    %45 = tpu.matmul %43, %44, %cst_23 {dimension_numbers = #tpu.dot_dimension_numbers<[1], [0], [0], [1], [0, 0, 1, 1], [], []>} : vector<8x1024xf32>, vector<1024x8xf32>, vector<8x8xf32> -> vector<8x8xf32>
    %c0_24 = arith.constant 0 : index
    %c0_25 = arith.constant 0 : index
    %46 = vector.load %arg8[%c0_24, %c0_25] : memref<1x1xf32, #tpu.memory_space<vmem>>, vector<1x1xf32>
    %47 = vector.broadcast %46 : vector<1x1xf32> to vector<8x8xf32>
    %48 = arith.addf %45, %47 : vector<8x8xf32>
    %c0_26 = arith.constant 0 : index
    %c0_27 = arith.constant 0 : index
    %49 = vector.load %arg4[%c0_26, %c0_27] : memref<8x8xi32, #tpu.memory_space<vmem>>, vector<8x8xi32>
    %c0_i32 = arith.constant 0 : i32
    %50 = vector.broadcast %c0_i32 : i32 to vector<8x8xi32>
    %51 = arith.cmpi sgt, %49, %50 : vector<8x8xi32>
    %cst_28 = arith.constant -1.000000e+04 : f32
    %52 = vector.broadcast %cst_28 : f32 to vector<8x8xf32>
    %53 = arith.select %51, %48, %52 : vector<8x8xi1>, vector<8x8xf32>
    %c0_29 = arith.constant 0 : index
    %c0_30 = arith.constant 0 : index
    %54 = vector.load %arg9[%c0_29, %c0_30] : memref<8x8xf32, #tpu.memory_space<vmem>>, vector<8x8xf32>
    tpu.vector_store %arg9[%c0_29, %c0_30], %53 {strides = array<i32>} : memref<8x8xf32, #tpu.memory_space<vmem>>, vector<8x8xf32>,
    return
  }
  func.func @transform_0(%arg0: i32) -> (i32, i32, i32) {
    %c0_i32 = arith.constant 0 : i32
    %c0_i32_0 = arith.constant 0 : i32
    %c0_i32_1 = arith.constant 0 : i32
    return %arg0, %c0_i32, %c0_i32_0 : i32, i32, i32
  }
  func.func @transform_1(%arg0: i32) -> (i32, i32) {
    %c0_i32 = arith.constant 0 : i32
    %c0_i32_0 = arith.constant 0 : i32
    return %arg0, %c0_i32 : i32, i32
  }
  func.func @transform_2(%arg0: i32) -> (i32, i32) {
    %c0_i32 = arith.constant 0 : i32
    %c0_i32_0 = arith.constant 0 : i32
    return %arg0, %c0_i32 : i32, i32
  }
  func.func @transform_3(%arg0: i32) -> (i32, i32) {
    %c0_i32 = arith.constant 0 : i32
    %c0_i32_0 = arith.constant 0 : i32
    return %arg0, %c0_i32 : i32, i32
  }
  func.func @transform_4(%arg0: i32) -> (i32, i32) {
    %c0_i32 = arith.constant 0 : i32
    %c0_i32_0 = arith.constant 0 : i32
    %c0_i32_1 = arith.constant 0 : i32
    return %c0_i32, %c0_i32_0 : i32, i32
  }
  func.func @transform_5(%arg0: i32) -> (i32, i32) {
    %c0_i32 = arith.constant 0 : i32
    %c0_i32_0 = arith.constant 0 : i32
    %c0_i32_1 = arith.constant 0 : i32
    return %c0_i32, %c0_i32_0 : i32, i32
  }
  func.func @transform_6(%arg0: i32) -> (i32, i32) {
    %c0_i32 = arith.constant 0 : i32
    %c0_i32_0 = arith.constant 0 : i32
    %c0_i32_1 = arith.constant 0 : i32
    return %c0_i32, %c0_i32_0 : i32, i32
  }
  func.func @transform_7(%arg0: i32) -> (i32, i32) {
    %c0_i32 = arith.constant 0 : i32
    %c0_i32_0 = arith.constant 0 : i32
    %c0_i32_1 = arith.constant 0 : i32
    return %c0_i32, %c0_i32_0 : i32, i32
  }
  func.func @transform_8(%arg0: i32) -> (i32, i32) {
    %c0_i32 = arith.constant 0 : i32
    %c0_i32_0 = arith.constant 0 : i32
    return %arg0, %c0_i32 : i32, i32
  }
}

</mosaic_0001>

<bundles_post_ra>
// kernel: tpu_custom_call.1
= control target key start
LH: loop header
LB: loop body
LE: loop exit
PB: predicated region body
PF: predicated region fallthrough
CT: control target
= control target key end

     0   :  { %s2232_s0 = inlined_call_operand.vmem [shape: f32[8,8,128], index: 0, kind: input, shape index: {}]   ;;  %s2233_s1 = inlined_call_operand.vmem [shape: f32[8,128], index: 1, kind: input, shape index: {}]   ;;  %s2234_s2 = inlined_call_operand.vmem [shape: f32[8,8], index: 2, kind: input, shape index: {}]   ;;  %s2235_s3 = inlined_call_operand.vmem [shape: s32[8,8], index: 3, kind: input, shape index: {}]   ;;  %s2236_s4 = inlined_call_operand.vmem [shape: f32[2,128], index: 4, kind: input, shape index: {}]   ;;  %s2237_s5 = inlined_call_operand.vmem [shape: f32[24,1024], index: 5, kind: input, shape index: {}]   ;;  %s2238_s6 = inlined_call_operand.vmem [shape: f32[1024,8], index: 6, kind: input, shape index: {}]   ;;  %s2239_s7 = inlined_call_operand.<no memory space> [shape: f32[1,1], index: 7, kind: input, shape index: {}]   ;;  %s2240_s8 = inlined_call_operand.hbm [shape: f32[8,8], index: 8, kind: output, shape index: {}]  }
   0x1   :  { %v13_v0 = vstv %s2239_s7 }
   0x2   :  { %14 = vst [vmem:[#allocation2] sm:$0x1] %v13_v0 }
   0x3   :  { %v1618_v1 = vld [vmem:[%s2232_s0 + $0x10] sm:$0xff]  ;;  %v32_v2 = vld [vmem:[%s2232_s0] sm:$0xff]  ;;  %v42_v3 = vlaneseq  ;;  %v1627_v4 = vld [vmem:[%s2232_s0 + $0x18] sm:$0xff] }
   0x4   :  { %60 = vadd.xlane.f32.xlu1 %v1618_v1  ;;  %56 = vadd.xlane.f32.xlu0 %v32_v2  ;;  %v33_v5 = vld [vmem:[%s2232_s0 + $0x8] sm:$0xff] }
   0x5   :  { %v1633_v6 = vshrl.u32 %v42_v3, 7 }
   0x6   :  { %15 = vsyncpa [#allocation4], 0  ;;  %v1562_v8 = vmov 1966171168   ;;  %v73_v10 = vmul.f32 %v33_v5, %v33_v5  ;;  %v72_v11 = vmul.f32 %v32_v2, %v32_v2  ;;  %v41_v12 = vld [vmem:[%s2236_s4] sm:$0x3]  ;;  %v74_v15 = vmul.f32 %v1618_v1, %v1618_v1 }
   0x7   :  { %v1636_v7 = vsub.s32 0, %v1633_v6  ;;  %v99_v9 = vunpack.c.l.s4 %v1562_v8  ;;  %v40_v16 = vld [vmem:[%s2233_s1] sm:$0xff]  ;;  %v75_v20 = vmul.f32 %v1627_v4, %v1627_v4  ;;  %v37_v21 = vld [vmem:[%s2232_s0 + $0x28] sm:$0xff]  ;;  %v38_v24 = vld [vmem:[%s2232_s0 + $0x30] sm:$0xff]  ;;  %v1665_v37 = vsub.s32 1, %v1633_v6  ;;  %s1564_s1 = smov 8  }
   0x8   :  { %62 = vadd.xlane.f32.xlu1 %v1627_v4  ;;  %58 = vadd.xlane.f32.xlu0 %v33_v5  ;;  %v36_v17 = vld [vmem:[%s2232_s0 + $0x20] sm:$0xff]  ;;  %v77_v27 = vmul.f32 %v37_v21, %v37_v21  ;;  %v39_v29 = vld [vmem:[%s2232_s0 + $0x38] sm:$0xff]  ;;  %v78_v33 = vmul.f32 %v38_v24, %v38_v24  ;;  %v1563_v60 = vmov 0   ;;  %vm447_vm0 = vcmask 1041409   ;;  %s1566_s25 = smov [#allocation3]  }
   0x9   :  { %v45_v13 = vrot.slane %v41_v12, %v1636_v7  ;;  %v100_v14 = vunpack.c.0.s8 %v99_v9  ;;  %v76_v23 = vmul.f32 %v36_v17, %v36_v17  ;;  %v79_v30 = vmul.f32 %v39_v29, %v39_v29  ;;  %1521 = vset.pattern.permute.xlu1 %v1563_v60  ;;  %1520 = vset.pattern.permute.xlu0 %v1563_v60  ;;  %s1218_s26 = sshll.u32 %s1566_s25, 4  ;;  %s1219_s26 = int_to_ptr.vmem [resolvable:$true] %s1218_s26 }
   0xa   :  { %v52_v42 = vrot.slane %v41_v12, %v1665_v37  ;;  %vm449_vm1 = vcmask 1042434   ;;  %vm451_vm2 = vcmask 1043459   ;;  %vm453_vm3 = vcmask 1044484   ;;  %s1538_s27 = scalar_lea.vmem %s1219_s26, 128  ;;  %p1543_p1 = scmp.lt.s32.totalorder %s1219_s26, %s1219_s26 }
   0xb   :  { %v46_v18 = vmul.f32 %v45_v13, %v40_v16  ;;  %v103_v19 = vsub.s32 %v100_v14, %v1633_v6  ;;  %vm455_vm4 = vcmask 1045509   ;;  %vm457_vm5 = vcmask 1046534   ;;  %p1539_p0 = scmp.ne.s32.totalorder %s1219_s26, %s1538_s27  ;;  %p1544_p2 = scmp.lt.s32.totalorder %s1538_s27, %s1538_s27 }
   0xc   :  { %82 = vadd.xlane.f32.xlu1 %v73_v10  ;;  %80 = vadd.xlane.f32.xlu0 %v72_v11  ;;  %v53_v48 = vmul.f32 %v52_v42, %v40_v16  ;;  %vm459_vm6 = vcmask 1047559   ;;  %vm466_vm7 = vcmask 64512   ;;  %vm468_vm8 = vcmask 130048  }
   0xd   :  { %v104_v22 = vrot.slane %v46_v18, %v103_v19  ;;  %v97_v26 = vcombine.high %v46_v18, %v46_v18  ;;  %vm494_vm9 = vcmask 195584   ;;  %p1545_p3 = por %p1544_p2, %p1543_p1 }
   0xf   :  { %v120_v25 = vrot.slane %v104_v22, %v103_v19  ;;  %v112_v28 = vcombine.high %v104_v22, %v104_v22  ;;  %v111_v32 = vrot.slane %v97_v26, %v103_v19  ;;  %p1546_p4 = pnand %p1545_p3, %p1539_p0 }
  0x10   :  { %84 = vadd.xlane.f32.xlu1 %v74_v15  ;;  %64 = vadd.xlane.f32.xlu0 %v36_v17 }
  0x11   :  { %v149_v31 = vrot.slane %v120_v25, %v1636_v7  ;;  %v142_v34 = vcombine.high %v120_v25, %v120_v25  ;;  %v134_v35 = vrot.slane %v112_v28, %v103_v19  ;;  %v113_v38 = vcombine.high %v111_v32, %v111_v32 }
  0x12   :  { %v127_v44 = vrot.slane %v111_v32, %v103_v19 }
  0x13   :  { %v186_v36 = vmul.f32 %v149_v31, %v32_v2  ;;  %v157_v39 = vrot.slane %v142_v34, %v1636_v7  ;;  %v153_v40 = vrot.slane %v134_v35, %v1636_v7  ;;  %v144_v41 = vcombine.high %v134_v35, %v134_v35 }
  0x14   :  { %86 = vadd.xlane.f32.xlu1 %v75_v20  ;;  %66 = vadd.xlane.f32.xlu0 %v37_v21  ;;  %v141_v43 = vrot.slane %v113_v38, %v103_v19  ;;  %v165_v49 = vrot.slane %v127_v44, %v1636_v7  ;;  %v143_v50 = vcombine.high %v127_v44, %v127_v44 }
  0x15   :  { %v188_v45 = vmul.f32 %v157_v39, %v1618_v1  ;;  %v187_v46 = vmul.f32 %v153_v40, %v33_v5  ;;  %v161_v47 = vrot.slane %v144_v41, %v1636_v7  ;;  %v269_v41 = vsub.s32 2, %v1633_v6 }
  0x16   :  { %v169_v52 = vrot.slane %v141_v43, %v1636_v7  ;;  %v145_v53 = vcombine.high %v141_v43, %v141_v43  ;;  %v190_v54 = vmul.f32 %v165_v49, %v36_v17  ;;  %v173_v57 = vrot.slane %v143_v50, %v1636_v7 }
  0x17   :  { %v189_v51 = vmul.f32 %v161_v47, %v1627_v4 }
  0x18   :  { %88 = vadd.xlane.f32.xlu1 %v76_v23  ;;  %68 = vadd.xlane.f32.xlu0 %v38_v24  ;;  %v191_v55 = vmul.f32 %v169_v52, %v37_v21  ;;  %v177_v56 = vrot.slane %v145_v53, %v1636_v7  ;;  %v192_v59 = vmul.f32 %v173_v57, %v38_v24 }
  0x1a   :  { %v193_v58 = vmul.f32 %v177_v56, %v39_v29 }
  0x1c   :  { %90 = vadd.xlane.f32.xlu1 %v77_v27  ;;  %70 = vadd.xlane.f32.xlu0 %v39_v29 }
  0x20   :  { %94 = vadd.xlane.f32.xlu1 %v79_v30  ;;  %92 = vadd.xlane.f32.xlu0 %v78_v33 }
  0x24   :  { %194 = vadd.xlane.f32.xlu1 %v186_v36  ;;  %47 = vadd.xlane.f32.xlu0 %v46_v18 }
  0x28   :  { %198 = vadd.xlane.f32.xlu1 %v188_v45  ;;  %196 = vadd.xlane.f32.xlu0 %v187_v46 }
  0x2c   :  { %200 = vadd.xlane.f32.xlu1 %v189_v51  ;;  %54 = vadd.xlane.f32.xlu0 %v53_v48  ;;  %v273_v51 = vsub.s32 3, %v1633_v6 }
  0x30   :  { %204 = vadd.xlane.f32.xlu1 %v191_v55  ;;  %202 = vadd.xlane.f32.xlu0 %v190_v54 }
  0x34   :  { %208 = vadd.xlane.f32.xlu1 %v193_v58  ;;  %206 = vadd.xlane.f32.xlu0 %v192_v59  ;;  %v277_v58 = vsub.s32 4, %v1633_v6 }
  0x91   :  { %v61_v61 = vpop.xlane.xlu1 %60  ;;  %v57_v62 = vpop.xlane.xlu0 %56 }
  0x92   :  { %v210_v9 = vmul.f32 0.0078125, %v57_v62  ;;  %v212_v13 = vmul.f32 0.0078125, %v61_v61 }
  0x94   :  { %v226_v16 = vmul.f32 %v210_v9, %v210_v9  ;;  %v228_v21 = vmul.f32 %v212_v13, %v212_v13 }
  0x95   :  { %v63_v63 = vpop.xlane.xlu1 %62  ;;  %v59_v0 = vpop.xlane.xlu0 %58 }
  0x96   :  { %v211_v8 = vmul.f32 0.0078125, %v59_v0  ;;  %v1679_v24 = vmul.f32 0.0078125, %v63_v63 }
  0x98   :  { %v227_v15 = vmul.f32 %v211_v8, %v211_v8  ;;  %v229_v34 = vmul.f32 %v1679_v24, %v1679_v24 }
  0x99   :  { %v83_v1 = vpop.xlane.xlu1 %82  ;;  %v81_v2 = vpop.xlane.xlu0 %80 }
  0x9a   :  { %v219_v12 = vmul.f32 0.0078125, %v83_v1  ;;  %v218_v14 = vmul.f32 0.0078125, %v81_v2  ;;  %v281_v1 = vsub.s32 5, %v1633_v6 }
  0x9c   :  { %v235_v20 = vsub.f32 %v219_v12, %v227_v15  ;;  %v234_v22 = vsub.f32 %v218_v14, %v226_v16 }
  0x9d   :  { %v85_v4 = vpop.xlane.xlu1 %84  ;;  %v65_v5 = vpop.xlane.xlu0 %64 }
  0x9e   :  { %v220_v17 = vmul.f32 0.0078125, %v85_v4  ;;  %v1677_v23 = vmul.f32 0.0078125, %v65_v5  ;;  %v243_v29 = vadd.f32 1e-05, %v235_v20  ;;  %v242_v30 = vadd.f32 1e-05, %v234_v22 }
  0xa0   :  { %v236_v25 = vsub.f32 %v220_v17, %v228_v21  ;;  %v230_v31 = vmul.f32 %v1677_v23, %v1677_v23  ;;  %1522 = vrsqrt.f32 %v243_v29 }
  0xa1   :  { %v87_v10 = vpop.xlane.xlu1 %86  ;;  %v67_v11 = vpop.xlane.xlu0 %66  ;;  %1524 = vrsqrt.f32 %v242_v30 }
  0xa2   :  { %v221_v32 = vmul.f32 0.0078125, %v87_v10  ;;  %v1683_v33 = vmul.f32 0.0078125, %v67_v11  ;;  %v244_v35 = vadd.f32 1e-05, %v236_v25 }
  0xa4   :  { %v237_v42 = vsub.f32 %v221_v32, %v229_v34  ;;  %v231_v43 = vmul.f32 %v1683_v33, %v1683_v33  ;;  %1526 = vrsqrt.f32 %v244_v35 }
  0xa5   :  { %v89_v18 = vpop.xlane.xlu1 %88  ;;  %v69_v19 = vpop.xlane.xlu0 %68 }
  0xa6   :  { %v222_v26 = vmul.f32 0.0078125, %v89_v18  ;;  %v1690_v45 = vmul.f32 0.0078125, %v69_v19  ;;  %v245_v52 = vadd.f32 1e-05, %v237_v42 }
  0xa8   :  { %v238_v36 = vsub.f32 %v222_v26, %v230_v31  ;;  %v232_v59 = vmul.f32 %v1690_v45, %v1690_v45 }
  0xa9   :  { %v91_v27 = vpop.xlane.xlu1 %90  ;;  %v71_v28 = vpop.xlane.xlu0 %70 }
  0xaa   :  { %v223_v38 = vmul.f32 0.0078125, %v91_v27  ;;  %v246_v44 = vadd.f32 1e-05, %v238_v36  ;;  %v1698_v53 = vmul.f32 0.0078125, %v71_v28  ;;  %v1523_v10 = vpop.eup %1522 }
  0xab   :  { %v1525_v14 = vpop.eup %1524 }
  0xac   :  { %v239_v46 = vsub.f32 %v223_v38, %v231_v43  ;;  %1528 = vrsqrt.f32 %v246_v44  ;;  %v233_v4 = vmul.f32 %v1698_v53, %v1698_v53 }
  0xad   :  { %v95_v39 = vpop.xlane.xlu1 %94  ;;  %v93_v40 = vpop.xlane.xlu0 %92  ;;  %1530 = vrsqrt.f32 %v245_v52 }
  0xae   :  { %v224_v54 = vmul.f32 0.0078125, %v93_v40  ;;  %v247_v60 = vadd.f32 1e-05, %v239_v46  ;;  %v225_v61 = vmul.f32 0.0078125, %v95_v39  ;;  %v1527_v22 = vpop.eup %1526 }
  0xb0   :  { %v240_v5 = vsub.f32 %v224_v54, %v232_v59  ;;  %1532 = vrsqrt.f32 %v247_v60  ;;  %v241_v15 = vsub.f32 %v225_v61, %v233_v4 }
  0xb1   :  { %v195_v47 = vpop.xlane.xlu1 %194  ;;  %v1692_v48 = vpop.xlane.xlu0 %47 }
  0xb2   :  { %v270_v49 = vrot.slane %v1692_v48, %v269_v41  ;;  %v266_v50 = vrot.slane %v1692_v48, %v1665_v37  ;;  %v262_v55 = vrot.slane %v1692_v48, %v1636_v7  ;;  %v278_v12 = vrot.slane %v1692_v48, %v277_v58 }
  0xb3   :  { %v248_v25 = vadd.f32 1e-05, %v240_v5  ;;  %v282_v27 = vrot.slane %v1692_v48, %v281_v1  ;;  %v249_v40 = vadd.f32 1e-05, %v241_v15 }
  0xb4   :  { %v301_v56 = vmul.f32 %v270_v49, %v212_v13  ;;  %v300_v57 = vmul.f32 %v266_v50, %v211_v8  ;;  %v299_v2 = vmul.f32 %v262_v55, %v210_v9  ;;  %v274_v8 = vrot.slane %v1692_v48, %v273_v51 }
  0xb5   :  { %v199_v62 = vpop.xlane.xlu1 %198  ;;  %v197_v63 = vpop.xlane.xlu0 %196  ;;  %v285_v9 = vsub.s32 6, %v1633_v6  ;;  %v303_v30 = vmul.f32 %v278_v12, %v1677_v23  ;;  %1534 = vrsqrt.f32 %v248_v25  ;;  %v304_v42 = vmul.f32 %v282_v27, %v1683_v33  ;;  %v472_v25 = vld [vmem:[%s2237_s5 + $0x10] sm:$0xff] }
  0xb6   :  { %v308_v0 = vsub.f32 %v197_v63, %v300_v57  ;;  %v309_v11 = vsub.f32 %v199_v62, %v301_v56  ;;  %v307_v13 = vsub.f32 %v195_v47, %v299_v2  ;;  %v302_v26 = vmul.f32 %v274_v8, %v1679_v24  ;;  %v1529_v39 = vpop.eup %1528  ;;  %v1230_v47 = vld [vmem:[#allocation2] ss:$0 sm:$0xff] }
  0xb7   :  { %v286_v23 = vrot.slane %v1692_v48, %v285_v9  ;;  %v1531_v46 = vpop.eup %1530  ;;  %1536 = vrsqrt.f32 %v249_v40 }
  0xb8   :  { %v316_v18 = vmul.f32 %v1523_v10, %v308_v0  ;;  %v315_v20 = vmul.f32 %v1525_v14, %v307_v13  ;;  %v317_v29 = vmul.f32 %v1527_v22, %v309_v11  ;;  %v478_v22 = vld [vmem:[%s2237_s5 + $0x40] sm:$0xff] }
  0xb9   :  { %v201_v16 = vpop.xlane.xlu1 %200  ;;  %v1712_v17 = vpop.xlane.xlu0 %54  ;;  %v305_v57 = vmul.f32 %v286_v23, %v1690_v45 }
  0xba   :  { %v331_v19 = vrot.slane %v1712_v17, %v1665_v37  ;;  %v327_v21 = vrot.slane %v1712_v17, %v1636_v7  ;;  %v335_v28 = vrot.slane %v1712_v17, %v269_v41  ;;  %v310_v37 = vsub.f32 %v201_v16, %v302_v26  ;;  %v1533_v55 = vpop.eup %1532  ;;  %v380_v26 = vld [vmem:[%s2234_s2] sm:$0xff] }
  0xbb   :  { %v289_v41 = vsub.s32 7, %v1633_v6  ;;  %v343_v44 = vrot.slane %v1712_v17, %v277_v58  ;;  %v339_v59 = vrot.slane %v1712_v17, %v273_v51  ;;  %v351_v51 = vrot.slane %v1712_v17, %v285_v9  ;;  %v473_v9 = vld [vmem:[%s2237_s5 + $0x18] sm:$0xff] }
  0xbc   :  { %v365_v31 = vadd.f32 %v331_v19, %v316_v18  ;;  %v364_v32 = vadd.f32 %v327_v21, %v315_v20  ;;  %v366_v38 = vadd.f32 %v335_v28, %v317_v29  ;;  %v318_v49 = vmul.f32 %v1531_v46, %v310_v37  ;;  %v479_v18 = vld [vmem:[%s2237_s5 + $0x48] sm:$0xff]  ;;  %v470_v21 = vld [vmem:[%s2237_s5] sm:$0xff]  ;;  %v480_v28 = vld [vmem:[%s2237_s5 + $0x50] sm:$0xff] }
  0xbd   :  { %v203_v34 = vpop.xlane.xlu0 %202  ;;  %v205_v24 = vpop.xlane.xlu1 %204  ;;  %v290_v33 = vrot.slane %v1692_v48, %v289_v41  ;;  %v347_v48 = vrot.slane %v1712_v17, %v281_v1  ;;  %v471_v1 = vld [vmem:[%s2237_s5 + $0x8] sm:$0xff]  ;;  %v1373_v27 = vpack.c.bf16 %v478_v22, %v470_v21  ;;  %v1377_v29 = vpack.c.bf16 %v480_v28, %v472_v25  ;;  %v488_v37 = vld [vmem:[%s2237_s5 + $0x90] sm:$0xff]  ;;  %v809_v22 = vld [vmem:[%s2238_s6 + $0x98] sm:$0xff] }
  0xbe   :  { %v311_v35 = vsub.f32 %v203_v34, %v303_v30  ;;  %v373_v36 = vmul.f32 0.088388346, %v365_v31  ;;  %v372_v7 = vmul.f32 0.088388346, %v364_v32  ;;  %v312_v50 = vsub.f32 %v205_v24, %v304_v42  ;;  %v487_v30 = vld [vmem:[%s2237_s5 + $0x88] sm:$0xff]  ;;  %v489_v31 = vld [vmem:[%s2237_s5 + $0x98] sm:$0xff] }
  0xbf   :  { %v374_v52 = vmul.f32 0.088388346, %v366_v38  ;;  %v367_v62 = vadd.f32 %v339_v59, %v318_v49  ;;  %v306_v0 = vmul.f32 %v290_v33, %v1698_v53  ;;  %v1535_v2 = vpop.eup %1534  ;;  %v355_v53 = vrot.slane %v1712_v17, %v289_v41  ;;  %v481_v17 = vld [vmem:[%s2237_s5 + $0x58] sm:$0xff]  ;;  %v486_v32 = vld [vmem:[%s2237_s5 + $0x80] sm:$0xff]  ;;  %v475_v34 = vld [vmem:[%s2237_s5 + $0x28] sm:$0xff] }
  0xc0   :  { %v319_v43 = vmul.f32 %v1529_v39, %v311_v35  ;;  %393 = vperm.xlu1 %1521, %v373_v36   ;;  %390 = vperm.xlu0 %1520, %v372_v7   ;;  %v320_v58 = vmul.f32 %v1533_v55, %v312_v50  ;;  %v1371_v19 = vpack.c.bf16 %v479_v18, %v471_v1  ;;  %v1565_v35 = vmov 0.0   ;;  %v483_v36 = vld [vmem:[%s2237_s5 + $0x68] sm:$0xff]  ;;  %v477_v7 = vld [vmem:[%s2237_s5 + $0x38] sm:$0xff]  ;;  %v492_v1 = vld [vmem:[%s2237_s5 + $0xb0] sm:$0xff] }
  0xc1   :  { %v207_v56 = vpop.xlane.xlu0 %206  ;;  %v209_v63 = vpop.xlane.xlu1 %208  ;;  %v375_v5 = vmul.f32 0.088388346, %v367_v62  ;;  %v1375_v20 = vpack.c.bf16 %v481_v17, %v473_v9  ;;  %562 = vmatprep.mubr.f32.mxu0 %v1565_v35  ;;  %633 = vmatprep.mubr.f32.mxu1 %v1565_v35  ;;  %v485_v38 = vld [vmem:[%s2237_s5 + $0x78] sm:$0xff]  ;;  %v1379_v39 = vpack.c.bf16 %v483_v36, %v475_v34  ;;  %v839_v18 = vld [vmem:[%s2238_s6 + $0x188] sm:$0xff]  ;;  %v790_v9 = vld [vmem:[%s2238_s6] sm:$0xff] }
  0xc2   :  { %v368_v54 = vadd.f32 %v343_v44, %v319_v43  ;;  %v313_v60 = vsub.f32 %v207_v56, %v305_v57  ;;  %v314_v45 = vsub.f32 %v209_v63, %v306_v0  ;;  %v369_v8 = vadd.f32 %v347_v48, %v320_v58  ;;  %v1537_v10 = vpop.eup %1536  ;;  %1372 = vmatprep.subr.bf16.mxu0 %v1371_v19  ;;  %v482_v0 = vld [vmem:[%s2237_s5 + $0x60] sm:$0xff]  ;;  %v476_v48 = vld [vmem:[%s2237_s5 + $0x30] sm:$0xff]  ;;  %v791_v19 = vld [vmem:[%s2238_s6 + $0x8] sm:$0xff] }
  0xc3   :  { %1376 = vmatprep.subr.bf16.mxu1 %v1375_v20  ;;  %1374 = vmatpush1.bf16.msra.mxu0 %v1373_v27  ;;  %v1383_v40 = vpack.c.bf16 %v485_v38, %v477_v7  ;;  %v414_v43 = vand.u32 127, %v42_v3  ;;  %v822_v17 = vld [vmem:[%s2238_s6 + $0x100] sm:$0xff]  ;;  %v823_v20 = vld [vmem:[%s2238_s6 + $0x108] sm:$0xff]  ;;  %v808_v21 = vld [vmem:[%s2238_s6 + $0x90] sm:$0xff] }
  0xc4   :  { %396 = vperm.xlu1 %1521, %v374_v52   ;;  %925 = vperm.xlu0 %1520, %v1230_v47   ;;  %v376_v61 = vmul.f32 0.088388346, %v368_v54  ;;  %v321_v4 = vmul.f32 %v1535_v2, %v313_v60  ;;  %v322_v11 = vmul.f32 %v1537_v10, %v314_v45  ;;  %v377_v12 = vmul.f32 0.088388346, %v369_v8  ;;  %v484_v2 = vld [vmem:[%s2237_s5 + $0x70] sm:$0xff]  ;;  %v825_v36 = vld [vmem:[%s2238_s6 + $0x118] sm:$0xff] }
  0xc5   :  { %1378 = vmatpush1.bf16.msra.mxu1 %v1377_v29  ;;  %502 = vmatprep.subr.mxu0 %v487_v30  ;;  %v417_v23 = vsub.s32 %v414_v43, %v1633_v6  ;;  %v840_v25 = vld [vmem:[%s2238_s6 + $0x190] sm:$0xff]  ;;  %v1389_v29 = vpack.c.bf16 %v791_v19, %v790_v9  ;;  %v1421_v30 = vpack.c.bf16 %v823_v20, %v822_v17  ;;  %v810_v7 = vld [vmem:[%s2238_s6 + $0xa0] sm:$0xff]  ;;  %v811_v38 = vld [vmem:[%s2238_s6 + $0xa8] sm:$0xff] }
  0xc6   :  { %v370_v13 = vadd.f32 %v351_v51, %v321_v4  ;;  %v371_v15 = vadd.f32 %v355_v53, %v322_v11  ;;  %573 = vmatprep.subr.mxu1 %v489_v31  ;;  %v1385_v51 = vpack.c.bf16 %v484_v2, %v476_v48  ;;  %v491_v11 = vld [vmem:[%s2237_s5 + $0xa8] sm:$0xff]  ;;  %v806_v53 = vld [vmem:[%s2238_s6 + $0x80] sm:$0xff]  ;;  %v792_v31 = vld [vmem:[%s2238_s6 + $0x10] sm:$0xff] }
  0xc7   :  { %503 = vmatpush1.msra.mxu0 %v486_v32  ;;  %v793_v32 = vld [vmem:[%s2238_s6 + $0x18] sm:$0xff]  ;;  %v794_v43 = vld [vmem:[%s2238_s6 + $0x20] sm:$0xff]  ;;  %v832_v9 = vld [vmem:[%s2238_s6 + $0x150] sm:$0xff] }
  0xc8   :  { %402 = vperm.xlu1 %1521, %v376_v61   ;;  %v378_v14 = vmul.f32 0.088388346, %v370_v13  ;;  %v379_v16 = vmul.f32 0.088388346, %v371_v15  ;;  %1380 = vmatprep.subr.bf16.mxu0 %v1379_v39  ;;  %v474_v61 = vld [vmem:[%s2237_s5 + $0x20] sm:$0xff]  ;;  %v833_v19 = vld [vmem:[%s2238_s6 + $0x158] sm:$0xff] }
  0xc9   :  { %574 = vmatpush1.msra.mxu1 %v488_v37  ;;  %v1381_v8 = vpack.c.bf16 %v482_v0, %v474_v61  ;;  %v838_v15 = vld [vmem:[%s2238_s6 + $0x180] sm:$0xff]  ;;  %v1391_v37 = vpack.c.bf16 %v809_v22, %v808_v21  ;;  %v815_v61 = vld [vmem:[%s2238_s6 + $0xc8] sm:$0xff] }
  0xca   :  { %1384 = vmatprep.subr.bf16.mxu1 %v1383_v40  ;;  %v1419_v28 = vpack.c.bf16 %v839_v18, %v838_v15  ;;  %v842_v39 = vld [vmem:[%s2238_s6 + $0x1a0] sm:$0xff]  ;;  %v843_v40 = vld [vmem:[%s2238_s6 + $0x1a8] sm:$0xff]  ;;  %v800_v15 = vld [vmem:[%s2238_s6 + $0x50] sm:$0xff] }
  0xcb   :  { %v798_v2 = vld [vmem:[%s2238_s6 + $0x40] sm:$0xff]  ;;  %v819_v20 = vld [vmem:[%s2238_s6 + $0xe8] sm:$0xff] }
  0xcc   :  { %399 = vperm.xlu1 %1521, %v375_v5   ;;  %v818_v17 = vld [vmem:[%s2238_s6 + $0xe0] sm:$0xff]  ;;  %v851_v22 = vld [vmem:[%s2238_s6 + $0x1e8] sm:$0xff] }
  0xcd   :  { %v850_v21 = vld [vmem:[%s2238_s6 + $0x1e0] sm:$0xff] }
  0xd0   :  { %405 = vperm.xlu1 %1521, %v377_v12   ;;  %v493_v12 = vld [vmem:[%s2237_s5 + $0xb8] sm:$0xff] }
  0xd4   :  { %408 = vperm.xlu1 %1521, %v378_v14   ;;  %v807_v14 = vld [vmem:[%s2238_s6 + $0x88] sm:$0xff] }
  0xd5   :  { %v1387_v27 = vpack.c.bf16 %v807_v14, %v806_v53 }
  0xd8   :  { %411 = vperm.xlu1 %1521, %v379_v16   ;;  %v490_v16 = vld [vmem:[%s2237_s5 + $0xa0] sm:$0xff] }
  0xdc   :  { %463 = vrot.lane.b32.xlu1 %v380_v26, %s1564_s1  ;;  %v841_v26 = vld [vmem:[%s2238_s6 + $0x198] sm:$0xff] }
  0xdd   :  { %v1423_v34 = vpack.c.bf16 %v841_v26, %v840_v25  ;;  %v1441_v26 = vpack.c.bf16 %v833_v19, %v832_v9 }
 0x13f   :  { %v394_v24 = vpop.permute.xlu1 %393  ;;  %v391_v44 = vpop.permute.xlu0 %390 }
 0x140   :  { %v422_v47 = vrot.slane %v394_v24, %v417_v23  ;;  %v418_v49 = vrot.slane %v391_v44, %v417_v23  ;;  %v1393_v24 = vpack.c.bf16 %v793_v32, %v792_v31  ;;  %v1427_v44 = vpack.c.bf16 %v843_v40, %v842_v39  ;;  %v834_v31 = vld [vmem:[%s2238_s6 + $0x160] sm:$0xff]  ;;  %v835_v32 = vld [vmem:[%s2238_s6 + $0x168] sm:$0xff]  ;;  %v853_v39 = vld [vmem:[%s2238_s6 + $0x1f8] sm:$0xff] }
 0x141   :  { %v804_v40 = vld [vmem:[%s2238_s6 + $0x70] sm:$0xff] }
 0x142   :  { %v448_v55 = vsel %vm447_vm0, %v422_v47, %v418_v49  ;;  %v827_v47 = vld [vmem:[%s2238_s6 + $0x128] sm:$0xff]  ;;  %v812_v49 = vld [vmem:[%s2238_s6 + $0xb0] sm:$0xff] }
 0x143   :  { %v397_v42 = vpop.permute.xlu1 %396 }
 0x144   :  { %v426_v50 = vrot.slane %v397_v42, %v417_v23 }
 0x146   :  { %v450_v56 = vsel %vm449_vm1, %v426_v50, %v448_v55  ;;  %v813_v50 = vld [vmem:[%s2238_s6 + $0xb8] sm:$0xff] }
 0x147   :  { %v403_v41 = vpop.permute.xlu1 %402 }
 0x148   :  { %v434_v3 = vrot.slane %v403_v41, %v417_v23  ;;  %v795_v41 = vld [vmem:[%s2238_s6 + $0x28] sm:$0xff] }
 0x149   :  { %v1397_v55 = vpack.c.bf16 %v795_v41, %v794_v43  ;;  %v836_v41 = vld [vmem:[%s2238_s6 + $0x170] sm:$0xff] }
 0x14b   :  { %v400_v46 = vpop.permute.xlu1 %399 }
 0x14c   :  { %v430_v54 = vrot.slane %v400_v46, %v417_v23  ;;  %v826_v46 = vld [vmem:[%s2238_s6 + $0x120] sm:$0xff] }
 0x14e   :  { %v452_v57 = vsel %vm451_vm2, %v430_v54, %v450_v56  ;;  %v845_v54 = vld [vmem:[%s2238_s6 + $0x1b8] sm:$0xff]  ;;  %v1429_v56 = vpack.c.bf16 %v827_v47, %v826_v46  ;;  %v870_v46 = vld [vmem:[%s2238_s6 + $0x280] sm:$0xff]  ;;  %v871_v47 = vld [vmem:[%s2238_s6 + $0x288] sm:$0xff] }
 0x14f   :  { %v406_v52 = vpop.permute.xlu1 %405  ;;  %v454_v6 = vsel %vm453_vm3, %v434_v3, %v452_v57  ;;  %v797_v57 = vld [vmem:[%s2238_s6 + $0x38] sm:$0xff] }
 0x150   :  { %v438_v59 = vrot.slane %v406_v52, %v417_v23  ;;  %v844_v52 = vld [vmem:[%s2238_s6 + $0x1b0] sm:$0xff] }
 0x151   :  { %v1431_v3 = vpack.c.bf16 %v845_v54, %v844_v52  ;;  %v903_v52 = vld [vmem:[%s2238_s6 + $0x388] sm:$0xff] }
 0x152   :  { %v456_v62 = vsel %vm455_vm4, %v438_v59, %v454_v6  ;;  %v1399_v59 = vpack.c.bf16 %v813_v50, %v812_v49  ;;  %v829_v6 = vld [vmem:[%s2238_s6 + $0x138] sm:$0xff]  ;;  %v902_v49 = vld [vmem:[%s2238_s6 + $0x380] sm:$0xff]  ;;  %v1451_v50 = vpack.c.bf16 %v871_v47, %v870_v46 }
 0x153   :  { %v409_v33 = vpop.permute.xlu1 %408  ;;  %v1483_v54 = vpack.c.bf16 %v903_v52, %v902_v49  ;;  %v863_v52 = vld [vmem:[%s2238_s6 + $0x248] sm:$0xff] }
 0x154   :  { %v442_v58 = vrot.slane %v409_v33, %v417_v23  ;;  %v796_v33 = vld [vmem:[%s2238_s6 + $0x30] sm:$0xff] }
 0x155   :  { %v1401_v0 = vpack.c.bf16 %v797_v57, %v796_v33  ;;  %v886_v33 = vld [vmem:[%s2238_s6 + $0x300] sm:$0xff]  ;;  %v887_v57 = vld [vmem:[%s2238_s6 + $0x308] sm:$0xff] }
 0x156   :  { %v458_v45 = vsel %vm457_vm5, %v442_v58, %v456_v62  ;;  %v828_v58 = vld [vmem:[%s2238_s6 + $0x130] sm:$0xff]  ;;  %v846_v62 = vld [vmem:[%s2238_s6 + $0x1c0] sm:$0xff] }
 0x157   :  { %v412_v60 = vpop.permute.xlu1 %411  ;;  %v1433_v48 = vpack.c.bf16 %v829_v6, %v828_v58  ;;  %v873_v6 = vld [vmem:[%s2238_s6 + $0x298] sm:$0xff] }
 0x158   :  { %v446_v63 = vrot.slane %v412_v60, %v417_v23  ;;  %v1395_v23 = vpack.c.bf16 %v811_v38, %v810_v7  ;;  %v814_v60 = vld [vmem:[%s2238_s6 + $0xc0] sm:$0xff]  ;;  %v852_v7 = vld [vmem:[%s2238_s6 + $0x1f0] sm:$0xff] }
 0x15a   :  { %v460_v4 = vsel %vm459_vm6, %v446_v63, %v458_v45  ;;  %v847_v63 = vld [vmem:[%s2238_s6 + $0x1c8] sm:$0xff] }
 0x15b   :  { %v464_v5 = vpop.permute.xlu1 %463  ;;  %v799_v45 = vld [vmem:[%s2238_s6 + $0x48] sm:$0xff] }
 0x15c   :  { %v467_v10 = vsel %vm466_vm7, %v460_v4, %v464_v5  ;;  %v1403_v4 = vpack.c.bf16 %v815_v61, %v814_v60  ;;  %v1435_v5 = vpack.c.bf16 %v847_v63, %v846_v62  ;;  %v1405_v53 = vpack.c.bf16 %v799_v45, %v798_v2  ;;  %v904_v60 = vld [vmem:[%s2238_s6 + $0x390] sm:$0xff]  ;;  %v905_v61 = vld [vmem:[%s2238_s6 + $0x398] sm:$0xff] }
 0x15d   :  { %v469_v13 = vsel %vm468_vm8, %v467_v10, 1.0  ;;  %v816_v10 = vld [vmem:[%s2238_s6 + $0xd0] sm:$0xff]  ;;  %v1485_v45 = vpack.c.bf16 %v887_v57, %v886_v33  ;;  %v881_v57 = vld [vmem:[%s2238_s6 + $0x2d8] sm:$0xff] }
 0x15e   :  { %1226 = vmatmul.mubr.msk.f32.vlgmr.msra.gmra.mrb[0].mxu0 %vm494_vm9, %v469_v13  ;;  %1227 = vmatmul.mubr.msk.f32.vlgmr.msra.gmra.mrb[0].mxu1 %vm494_vm9, %v469_v13  ;;  %v880_v33 = vld [vmem:[%s2238_s6 + $0x2d0] sm:$0xff] }
 0x15f   :  { %1382 = vmatpush1.bf16.msra.mxu0 %v1381_v8  ;;  %1386 = vmatpush1.bf16.msra.mxu1 %v1385_v51  ;;  %v830_v8 = vld [vmem:[%s2238_s6 + $0x140] sm:$0xff]  ;;  %v831_v51 = vld [vmem:[%s2238_s6 + $0x148] sm:$0xff] }
 0x160   :  { %644 = vmatprep.subr.mxu0 %v491_v11  ;;  %715 = vmatprep.subr.mxu1 %v493_v12  ;;  %v817_v11 = vld [vmem:[%s2238_s6 + $0xd8] sm:$0xff]  ;;  %v848_v12 = vld [vmem:[%s2238_s6 + $0x1d0] sm:$0xff]  ;;  %v1437_v14 = vpack.c.bf16 %v831_v51, %v830_v8  ;;  %v1487_v51 = vpack.c.bf16 %v905_v61, %v904_v60  ;;  %v1471_v60 = vpack.c.bf16 %v881_v57, %v880_v33 }
 0x161   :  { %704 = vmatprep.mubr.f32.mxu0 %v1565_v35  ;;  %775 = vmatprep.mubr.f32.mxu1 %v1565_v35  ;;  %v824_v35 = vld [vmem:[%s2238_s6 + $0x110] sm:$0xff] }
 0x162   :  { %v1425_v42 = vpack.c.bf16 %v825_v36, %v824_v35  ;;  %v820_v35 = vld [vmem:[%s2238_s6 + $0xf0] sm:$0xff]  ;;  %v821_v36 = vld [vmem:[%s2238_s6 + $0xf8] sm:$0xff] }
 0x163   :  { %645 = vmatpush1.msra.mxu0 %v490_v16  ;;  %716 = vmatpush1.msra.mxu1 %v492_v1  ;;  %v801_v16 = vld [vmem:[%s2238_s6 + $0x58] sm:$0xff]  ;;  %v1407_v1 = vpack.c.bf16 %v817_v11, %v816_v10  ;;  %v1415_v38 = vpack.c.bf16 %v821_v36, %v820_v35  ;;  %v856_v10 = vld [vmem:[%s2238_s6 + $0x210] sm:$0xff] }
 0x164   :  { %1228 = vmatmul.mubr.msk.f32.vlgmr.msra.gmra.mrb[2].mxu0 %vm494_vm9, %v469_v13  ;;  %1229 = vmatmul.mubr.msk.f32.vlgmr.msra.gmra.mrb[2].mxu1 %vm494_vm9, %v469_v13  ;;  %v849_v13 = vld [vmem:[%s2238_s6 + $0x1d8] sm:$0xff]  ;;  %v1409_v25 = vpack.c.bf16 %v801_v16, %v800_v15  ;;  %v906_v15 = vld [vmem:[%s2238_s6 + $0x3a0] sm:$0xff]  ;;  %v907_v16 = vld [vmem:[%s2238_s6 + $0x3a8] sm:$0xff] }
 0x165   :  { %1388 = vmatprep.subr.bf16.mxu0 %v1387_v27  ;;  %1420 = vmatprep.subr.bf16.mxu1 %v1419_v28  ;;  %v1439_v18 = vpack.c.bf16 %v849_v13, %v848_v12  ;;  %v802_v27 = vld [vmem:[%s2238_s6 + $0x60] sm:$0xff]  ;;  %v1411_v28 = vpack.c.bf16 %v819_v20, %v818_v17  ;;  %v857_v11 = vld [vmem:[%s2238_s6 + $0x218] sm:$0xff]  ;;  %v888_v12 = vld [vmem:[%s2238_s6 + $0x310] sm:$0xff] }
 0x166   :  { %1390 = vmatpush3.bf16.msra.mxu0 %v1389_v29  ;;  %1422 = vmatpush3.bf16.msra.mxu1 %v1421_v30  ;;  %v1443_v29 = vpack.c.bf16 %v851_v22, %v850_v21  ;;  %v803_v30 = vld [vmem:[%s2238_s6 + $0x68] sm:$0xff]  ;;  %v889_v13 = vld [vmem:[%s2238_s6 + $0x318] sm:$0xff]  ;;  %v1457_v9 = vpack.c.bf16 %v857_v11, %v856_v10  ;;  %v858_v21 = vld [vmem:[%s2238_s6 + $0x220] sm:$0xff] }
 0x167   :  { %1392 = vmatprep.subr.bf16.mxu0 %v1391_v37  ;;  %1424 = vmatprep.subr.bf16.mxu1 %v1423_v34  ;;  %v1413_v37 = vpack.c.bf16 %v803_v30, %v802_v27  ;;  %v1445_v34 = vpack.c.bf16 %v835_v32, %v834_v31  ;;  %v1489_v20 = vpack.c.bf16 %v889_v13, %v888_v12  ;;  %v859_v22 = vld [vmem:[%s2238_s6 + $0x228] sm:$0xff]  ;;  %v876_v31 = vld [vmem:[%s2238_s6 + $0x2b0] sm:$0xff]  ;;  %v877_v32 = vld [vmem:[%s2238_s6 + $0x2b8] sm:$0xff] }
 0x168   :  { %v891_v30 = vld [vmem:[%s2238_s6 + $0x328] sm:$0xff]  ;;  %v1461_v35 = vpack.c.bf16 %v859_v22, %v858_v21  ;;  %v864_v61 = vld [vmem:[%s2238_s6 + $0x250] sm:$0xff]  ;;  %v866_v11 = vld [vmem:[%s2238_s6 + $0x260] sm:$0xff] }
 0x169   :  { %v867_v12 = vld [vmem:[%s2238_s6 + $0x268] sm:$0xff]  ;;  %v898_v13 = vld [vmem:[%s2238_s6 + $0x360] sm:$0xff]  ;;  %v868_v22 = vld [vmem:[%s2238_s6 + $0x270] sm:$0xff] }
 0x16a   :  { %1394 = vmatpush3.bf16.msra.mxu0 %v1393_v24  ;;  %1426 = vmatpush3.bf16.msra.mxu1 %v1425_v42  ;;  %v805_v24 = vld [vmem:[%s2238_s6 + $0x78] sm:$0xff]  ;;  %v1447_v42 = vpack.c.bf16 %v853_v39, %v852_v7  ;;  %v1463_v7 = vpack.c.bf16 %v877_v32, %v876_v31 }
 0x16b   :  { %1396 = vmatprep.subr.bf16.mxu0 %v1395_v23  ;;  %1428 = vmatprep.subr.bf16.mxu1 %v1427_v44  ;;  %v1417_v43 = vpack.c.bf16 %v805_v24, %v804_v40  ;;  %v837_v23 = vld [vmem:[%s2238_s6 + $0x178] sm:$0xff]  ;;  %v892_v40 = vld [vmem:[%s2238_s6 + $0x330] sm:$0xff] }
 0x16c   :  { %v1449_v44 = vpack.c.bf16 %v837_v23, %v836_v41  ;;  %v861_v39 = vld [vmem:[%s2238_s6 + $0x238] sm:$0xff]  ;;  %v879_v41 = vld [vmem:[%s2238_s6 + $0x2c8] sm:$0xff]  ;;  %v910_v23 = vld [vmem:[%s2238_s6 + $0x3c0] sm:$0xff] }
 0x16e   :  { %1398 = vmatpush3.bf16.msra.mxu0 %v1397_v55  ;;  %1430 = vmatpush3.bf16.msra.mxu1 %v1429_v56  ;;  %v854_v55 = vld [vmem:[%s2238_s6 + $0x200] sm:$0xff]  ;;  %v855_v56 = vld [vmem:[%s2238_s6 + $0x208] sm:$0xff] }
 0x16f   :  { %1400 = vmatprep.subr.bf16.mxu0 %v1399_v59  ;;  %1432 = vmatprep.subr.bf16.mxu1 %v1431_v3  ;;  %v872_v59 = vld [vmem:[%s2238_s6 + $0x290] sm:$0xff]  ;;  %v1453_v2 = vpack.c.bf16 %v855_v56, %v854_v55  ;;  %v895_v56 = vld [vmem:[%s2238_s6 + $0x348] sm:$0xff] }
 0x170   :  { %v1455_v8 = vpack.c.bf16 %v873_v6, %v872_v59  ;;  %v912_v59 = vld [vmem:[%s2238_s6 + $0x3d0] sm:$0xff] }
 0x172   :  { %1402 = vmatpush3.bf16.msra.mxu0 %v1401_v0  ;;  %1434 = vmatpush3.bf16.msra.mxu1 %v1433_v48 }
 0x173   :  { %1404 = vmatprep.subr.bf16.mxu0 %v1403_v4  ;;  %1436 = vmatprep.subr.bf16.mxu1 %v1435_v5 }
 0x176   :  { %1406 = vmatpush3.bf16.msra.mxu0 %v1405_v53  ;;  %1438 = vmatpush3.bf16.msra.mxu1 %v1437_v14  ;;  %v874_v53 = vld [vmem:[%s2238_s6 + $0x2a0] sm:$0xff]  ;;  %v875_v14 = vld [vmem:[%s2238_s6 + $0x2a8] sm:$0xff] }
 0x177   :  { %1408 = vmatprep.subr.bf16.mxu0 %v1407_v1  ;;  %1440 = vmatprep.subr.bf16.mxu1 %v1439_v18 }
 0x17a   :  { %1410 = vmatpush3.bf16.msra.mxu0 %v1409_v25  ;;  %1442 = vmatpush3.bf16.msra.mxu1 %v1441_v26  ;;  %v890_v25 = vld [vmem:[%s2238_s6 + $0x320] sm:$0xff] }
 0x17b   :  { %1412 = vmatprep.subr.bf16.mxu0 %v1411_v28  ;;  %1444 = vmatprep.subr.bf16.mxu1 %v1443_v29  ;;  %v1459_v28 = vpack.c.bf16 %v875_v14, %v874_v53  ;;  %v1491_v29 = vpack.c.bf16 %v907_v16, %v906_v15  ;;  %v1493_v36 = vpack.c.bf16 %v891_v30, %v890_v25  ;;  %v899_v14 = vld [vmem:[%s2238_s6 + $0x368] sm:$0xff]  ;;  %v884_v15 = vld [vmem:[%s2238_s6 + $0x2f0] sm:$0xff]  ;;  %v885_v16 = vld [vmem:[%s2238_s6 + $0x2f8] sm:$0xff] }
 0x17c   :  { %v1479_v21 = vpack.c.bf16 %v885_v16, %v884_v15  ;;  %v869_v25 = vld [vmem:[%s2238_s6 + $0x278] sm:$0xff] }
 0x17e   :  { %1414 = vmatpush3.bf16.msra.mxu0 %v1413_v37  ;;  %1446 = vmatpush3.bf16.msra.mxu1 %v1445_v34  ;;  %v908_v37 = vld [vmem:[%s2238_s6 + $0x3b0] sm:$0xff]  ;;  %v909_v34 = vld [vmem:[%s2238_s6 + $0x3b8] sm:$0xff] }
 0x17f   :  { %1416 = vmatprep.subr.bf16.mxu0 %v1415_v38  ;;  %1448 = vmatprep.subr.bf16.mxu1 %v1447_v42  ;;  %v860_v38 = vld [vmem:[%s2238_s6 + $0x230] sm:$0xff]  ;;  %v1495_v24 = vpack.c.bf16 %v909_v34, %v908_v37  ;;  %v893_v42 = vld [vmem:[%s2238_s6 + $0x338] sm:$0xff] }
 0x180   :  { %v1465_v46 = vpack.c.bf16 %v861_v39, %v860_v38  ;;  %v1497_v47 = vpack.c.bf16 %v893_v42, %v892_v40  ;;  %v926_v39 = vpop.permute.xlu0 %925 }
 0x182   :  { %1418 = vmatpush3.bf16.msra.mxu0 %v1417_v43  ;;  %1450 = vmatpush3.bf16.msra.mxu1 %v1449_v44  ;;  %v878_v43 = vld [vmem:[%s2238_s6 + $0x2c0] sm:$0xff]  ;;  %v911_v44 = vld [vmem:[%s2238_s6 + $0x3c8] sm:$0xff] }
 0x183   :  { %1452 = vmatprep.subr.bf16.mxu0 %v1451_v50  ;;  %1484 = vmatprep.subr.bf16.mxu1 %v1483_v54  ;;  %v1467_v49 = vpack.c.bf16 %v879_v41, %v878_v43  ;;  %v862_v50 = vld [vmem:[%s2238_s6 + $0x240] sm:$0xff]  ;;  %v1499_v55 = vpack.c.bf16 %v911_v44, %v910_v23 }
 0x184   :  { %v894_v54 = vld [vmem:[%s2238_s6 + $0x340] sm:$0xff] }
 0x185   :  { %v1501_v6 = vpack.c.bf16 %v895_v56, %v894_v54 }
 0x231   :  { %v564_v3 = vpop.f32.mrb[0].mxu0  ;;  %v635_v58 = vpop.f32.mrb[0].mxu1 }
 0x232   :  { %v566_v62 = vpop.f32.mrb[1].mxu0  ;;  %v637_v63 = vpop.f32.mrb[1].mxu1  ;;  %v782_v4 = vmax.f32 %v564_v3, 0.0  ;;  %v784_v5 = vmax.f32 %v635_v58, 0.0  ;;  %v913_v3 = vld [vmem:[%s2238_s6 + $0x3d8] sm:$0xff]  ;;  %v1469_v58 = vpack.c.bf16 %v863_v52, %v862_v50 }
 0x233   :  { %v783_v0 = vmax.f32 %v566_v62, 0.0  ;;  %v785_v48 = vmax.f32 %v637_v63, 0.0  ;;  %v865_v62 = vld [vmem:[%s2238_s6 + $0x258] sm:$0xff]  ;;  %v896_v63 = vld [vmem:[%s2238_s6 + $0x350] sm:$0xff] }
 0x235   :  { %992 = vmatprep.mubr.f32.mxu0 %v783_v0  ;;  %1062 = vmatprep.mubr.f32.mxu1 %v785_v48  ;;  %v1503_v0 = vpack.c.bf16 %v913_v3, %v912_v59  ;;  %v897_v48 = vld [vmem:[%s2238_s6 + $0x358] sm:$0xff] }
 0x236   :  { %993 = vmatmul.mubr.f32.vlgmr.msra.gmra.mrb[4].mxu0 %v782_v4  ;;  %1063 = vmatmul.mubr.f32.vlgmr.msra.gmra.mrb[4].mxu1 %v784_v5  ;;  %v914_v4 = vld [vmem:[%s2238_s6 + $0x3e0] sm:$0xff]  ;;  %v915_v5 = vld [vmem:[%s2238_s6 + $0x3e8] sm:$0xff] }
 0x237   :  { %v2078_v1 = vpop.f32.mrb[2].mxu0  ;;  %v2080_v18 = vpop.f32.mrb[2].mxu1  ;;  %1454 = vmatpush3.bf16.msra.mxu0 %v1453_v2  ;;  %1486 = vmatpush3.bf16.msra.mxu1 %v1485_v45  ;;  %v882_v2 = vld [vmem:[%s2238_s6 + $0x2e0] sm:$0xff]  ;;  %v883_v45 = vld [vmem:[%s2238_s6 + $0x2e8] sm:$0xff]  ;;  %v1507_v53 = vpack.c.bf16 %v915_v5, %v914_v4 }
 0x238   :  { %v708_v19 = vpop.f32.mrb[3].mxu0  ;;  %v779_v17 = vpop.f32.mrb[3].mxu1  ;;  %1456 = vmatprep.subr.bf16.mxu0 %v1455_v8  ;;  %1488 = vmatprep.subr.bf16.mxu1 %v1487_v51  ;;  %v1473_v8 = vpack.c.bf16 %v865_v62, %v864_v61  ;;  %v1505_v51 = vpack.c.bf16 %v897_v48, %v896_v63  ;;  %v1475_v10 = vpack.c.bf16 %v883_v45, %v882_v2  ;;  %v786_v31 = vmax.f32 %v2078_v1, 0.0  ;;  %v1208_v1 = vld [vmem:[%s2235_s3] sm:$0xff] }
 0x239   :  { %v787_v26 = vmax.f32 %v708_v19, 0.0  ;;  %v789_v27 = vmax.f32 %v779_v17, 0.0  ;;  %v917_v19 = vld [vmem:[%s2238_s6 + $0x3f8] sm:$0xff]  ;;  %v1477_v17 = vpack.c.bf16 %v867_v12, %v866_v11  ;;  %v788_v32 = vmax.f32 %v2080_v18, 0.0 }
 0x23a   :  { %vm1209_vm10 = vcmp.gt.s32.totalorder %v1208_v1, 0 }
 0x23b   :  { %1458 = vmatpush3.bf16.msra.mxu0 %v1457_v9  ;;  %1132 = vmatprep.mubr.f32.mxu0 %v787_v26  ;;  %v916_v9 = vld [vmem:[%s2238_s6 + $0x3f0] sm:$0xff] }
 0x23c   :  { %1490 = vmatpush3.bf16.msra.mxu1 %v1489_v20  ;;  %1202 = vmatprep.mubr.f32.mxu1 %v789_v27  ;;  %v1509_v20 = vpack.c.bf16 %v899_v14, %v898_v13  ;;  %v1511_v26 = vpack.c.bf16 %v917_v19, %v916_v9  ;;  %v900_v27 = vld [vmem:[%s2238_s6 + $0x370] sm:$0xff] }
 0x23d   :  { %1460 = vmatprep.subr.bf16.mxu0 %v1459_v28  ;;  %1492 = vmatprep.subr.bf16.mxu1 %v1491_v29  ;;  %v901_v28 = vld [vmem:[%s2238_s6 + $0x378] sm:$0xff]  ;;  %v1481_v29 = vpack.c.bf16 %v869_v25, %v868_v22 }
 0x23e   :  { %v1513_v30 = vpack.c.bf16 %v901_v28, %v900_v27 }
 0x23f   :  { %1462 = vmatpush3.bf16.msra.mxu0 %v1461_v35 }
 0x240   :  { %1494 = vmatpush3.bf16.msra.mxu1 %v1493_v36  ;;  %1464 = vmatprep.subr.bf16.mxu0 %v1463_v7 }
 0x241   :  { %1496 = vmatprep.subr.bf16.mxu1 %v1495_v24 }
 0x243   :  { %1466 = vmatpush3.bf16.msra.mxu0 %v1465_v46 }
 0x244   :  { %1498 = vmatpush3.bf16.msra.mxu1 %v1497_v47  ;;  %1468 = vmatprep.subr.bf16.mxu0 %v1467_v49 }
 0x245   :  { %1500 = vmatprep.subr.bf16.mxu1 %v1499_v55 }
 0x247   :  { %1470 = vmatpush3.bf16.msra.mxu0 %v1469_v58 }
 0x248   :  { %1502 = vmatpush3.bf16.msra.mxu1 %v1501_v6  ;;  %1472 = vmatprep.subr.bf16.mxu0 %v1471_v60 }
 0x249   :  { %1504 = vmatprep.subr.bf16.mxu1 %v1503_v0 }
 0x24b   :  { %1474 = vmatpush3.bf16.msra.mxu0 %v1473_v8 }
 0x24c   :  { %1506 = vmatpush3.bf16.msra.mxu1 %v1505_v51  ;;  %1476 = vmatprep.subr.bf16.mxu0 %v1475_v10 }
 0x24d   :  { %1508 = vmatprep.subr.bf16.mxu1 %v1507_v53 }
 0x24f   :  { %1478 = vmatpush3.bf16.msra.mxu0 %v1477_v17 }
 0x250   :  { %1510 = vmatpush3.bf16.msra.mxu1 %v1509_v20  ;;  %1480 = vmatprep.subr.bf16.mxu0 %v1479_v21 }
 0x251   :  { %1512 = vmatprep.subr.bf16.mxu1 %v1511_v26 }
 0x253   :  { %1482 = vmatpush3.bf16.msra.mxu0 %v1481_v29 }
 0x254   :  { %1514 = vmatpush3.bf16.msra.mxu1 %v1513_v30 }
 0x256   :  { %1133 = vmatmul.mubr.f32.vlgmr.msra.gmra.mrb[6].mxu0 %v786_v31 }
 0x257   :  { %1203 = vmatmul.mubr.f32.vlgmr.msra.gmra.mrb[6].mxu1 %v788_v32 }
 0x309   :  { %v1263_v37 = vpop.f32.mrb[4].mxu0  ;;  %v1298_v34 = vpop.f32.mrb[4].mxu1 }
 0x30a   :  { %v1264_v35 = vpop.f32.mrb[5].mxu0  ;;  %v1299_v36 = vpop.f32.mrb[5].mxu1 }
 0x30b   :  { %v1265_v7 = vadd.f32 %v1264_v35, %v1263_v37  ;;  %v1300_v38 = vadd.f32 %v1299_v36, %v1298_v34 }
 0x30d   :  { %v995_v40 = vadd.f32 %v1265_v7, %v926_v39 }
 0x30f   :  { %v1065_v24 = vadd.f32 %v1300_v38, %v995_v40 }
 0x329   :  { %v1333_v42 = vpop.f32.mrb[6].mxu0 }
 0x32a   :  { %v1368_v43 = vpop.f32.mrb[6].mxu1  ;;  %v1334_v41 = vpop.f32.mrb[7].mxu0 }
 0x32b   :  { %v1335_v23 = vadd.f32 %v1334_v41, %v1333_v42  ;;  %v1369_v44 = vpop.f32.mrb[7].mxu1 }
 0x32c   :  { %v1370_v18 = vadd.f32 %v1369_v44, %v1368_v43 }
 0x32d   :  { %v1135_v46 = vadd.f32 %v1335_v23, %v1065_v24 }
 0x32f   :  { %v1205_v47 = vadd.f32 %v1370_v18, %v1135_v46 }
 0x331   :  { %v1210_v49 = vsel %vm1209_vm10, %v1205_v47, -10000.0 }
 0x332   :  { %1211 = vst.msk [vmem:[#allocation3] sm:$0xff] %vm466_vm7, %v1210_v49 }
 0x333   :  { %1549 = shalt.err (!%p1546_p4)
}
 0x334   :  { %s1550_s3 = scalar_lea.hbm %s2240_s8, 128 }
 0x335   :  { %p1551_p5 = scmp.ne.s32.totalorder %s2240_s8, %s1550_s3  ;;  %p1554_p6 = scmp.lt.u32.totalorder %s1550_s3, %s2240_s8 }
 0x337   :  { %p1556_p7 = pnand %p1554_p6, %p1551_p5 }
 0x339   :  { %1559 = shalt.err (!%p1556_p7)
}
 0x33a   :  { %1221 = dma.vmem_to_hbm [thread:$0]  %s1219_s26, 128, %s2240_s8, [#allocation4]  }
 0x33b   :  { %1560 = dma.done.wait [#allocation4], 128  }
 0x33c   :  { %1561 = vsyncadd [#allocation4], 4294967168 }
 0x33d   :  { %1225 = vsyncpa [#allocation4], 1 }

</bundles_post_ra>
